<compile_context>
chip_gen: v6e
topology: v6e:2x2x1
jax: 0.10.0
libtpu: 0.0.40
codegen_flags: <defaults>
</compile_context>

<pallas_src>
import jax
import jax.numpy as jnp
from jax import lax
from jax.experimental import pallas as pl
from jax.experimental.pallas import tpu as pltpu


def _round_up(a, m):
    return (a + m - 1) // m * m


def make_textcnn_kernel(max_k, seq_pad):
    S = seq_pad

    def kernel(x_ref, w_ref, cb_ref, tmax_ref, fcw_ref, fcb_ref, out_ref):
        M = x_ref.shape[0]
        n_pad = cb_ref.shape[1]

        # Dense bf16 stream; widen once to f32 so the sublane rolls work on
        # unpacked 32-bit vregs.
        x = x_ref[...].astype(jnp.float32)                       # (M, E_pad)

        # In-kernel im2col-by-shift: tap i uses rows shifted up by i (XLU
        # sublane roll), then one bf16 MXU matmul per tap against its
        # (E_pad, N_pad) weight plane, accumulated in f32.  Weight planes with
        # i >= k are zero for filters of width k, and wrapped / padded time
        # rows are masked out below, so the block-wrapping roll is harmless.
        acc = jnp.zeros((M, n_pad), jnp.float32)
        for i in range(max_k):
            xi = x if i == 0 else pltpu.roll(x, M - i, axis=0)   # row r <- x[r + i]
            acc = acc + jnp.dot(xi.astype(jnp.bfloat16), w_ref[i],
                                preferred_element_type=jnp.float32)

        # conv bias + ReLU, then zero invalid time positions (t >= S - k + 1,
        # which also covers roll wrap-around, sequence padding and the padded
        # output columns).
        row = lax.broadcasted_iota(jnp.int32, (M, 1), 0)
        t = (row & (S - 1)) if (S & (S - 1)) == 0 else (row % S)
        act = jnp.maximum(acc + cb_ref[...], 0.0)
        act = jnp.where(t < tmax_ref[...], act, 0.0)

        # Max-pool over time (valid ReLU outputs are >= 0, masked rows are 0,
        # so the extra zeros never win).  S is a multiple of 8 -> reshape is
        # sublane-tile aligned.
        pooled = jnp.max(act.reshape(M // S, S, n_pad), axis=1)  # (B_blk, N_pad)

        # Fused final Linear (bf16 MXU, f32 accumulate, zero-padded rows/cols).
        logits = jnp.dot(pooled.astype(jnp.bfloat16), fcw_ref[...],
                         preferred_element_type=jnp.float32) + fcb_ref[...]
        out_ref[...] = logits.astype(out_ref.dtype)

    return kernel


def textcnn_forward(x_emb, conv_ws, conv_bs, fc_w, fc_b, filter_sizes, *, b_blk=256):
    """x_emb: (B, S, E) float32 embedded tokens. Returns (B, num_classes)."""
    B, S, E = x_emb.shape
    F_out = conv_ws[0].shape[-1]
    n_filt = len(filter_sizes)
    nF = F_out * n_filt
    C = fc_w.shape[1]
    max_k = max(filter_sizes)
    assert max_k <= S, "filter size larger than sequence length"

    # Padded sizes: lane-dense outputs, sublane-aligned time axis, bf16-tile
    # aligned embedding dim.
    S_pad = _round_up(S, 8)
    E_pad = _round_up(E, 16)
    B_BLK = _round_up(min(b_blk, max(B, 8)), 8)     # batch items per grid step
    B_pad = _round_up(B, B_BLK)
    M_blk = B_BLK * S_pad
    N_pad = _round_up(nF, 128)
    C_pad = _round_up(C, 128)

    f32 = jnp.float32

    # --- streamed input: dense bf16 (B_pad*S_pad, E_pad) ---------------------
    xf = jnp.zeros((B_pad, S_pad, E_pad), f32)
    xf = xf.at[:B, :S, :E].set(x_emb.astype(f32))
    x_in = xf.reshape(B_pad * S_pad, E_pad).astype(jnp.bfloat16)

    # --- per-shift conv weight planes, bias, per-column valid length ---------
    # Invariant relied on by the kernel: w_stack[i, :, cols_of_filter_k] == 0
    # for i >= k (holds by construction: initialized to zeros).
    w_stack = jnp.zeros((max_k, E_pad, N_pad), f32)
    cb = jnp.zeros((1, N_pad), f32)
    tmax = jnp.zeros((1, N_pad), jnp.int32)
    for idx, (w, b, k) in enumerate(zip(conv_ws, conv_bs, filter_sizes)):
        assert w.shape == (k, E, F_out) and k <= max_k
        c0 = idx * F_out
        for i in range(k):
            w_stack = w_stack.at[i, :E, c0:c0 + F_out].set(w[i])
        cb = cb.at[0, c0:c0 + F_out].set(b[0])
        tmax = tmax.at[0, c0:c0 + F_out].set(S - k + 1)
    w_stack = w_stack.astype(jnp.bfloat16)

    # --- padded fc weights (bf16 MXU path) ------------------------------------
    fcw = jnp.zeros((N_pad, C_pad), f32).at[:nF, :C].set(fc_w).astype(jnp.bfloat16)
    fcb = jnp.zeros((1, C_pad), f32).at[0, :C].set(fc_b[0])

    kernel = make_textcnn_kernel(max_k=max_k, seq_pad=S_pad)

    out = pl.pallas_call(
        kernel,
        out_shape=jax.ShapeDtypeStruct((B_pad, C_pad), f32),
        grid=(B_pad // B_BLK,),
        in_specs=[
            pl.BlockSpec((M_blk, E_pad), lambda b: (b, 0)),            # x (streamed, dense bf16)
            pl.BlockSpec((max_k, E_pad, N_pad), lambda b: (0, 0, 0)),  # conv weight planes (resident)
            pl.BlockSpec((1, N_pad), lambda b: (0, 0)),                # conv bias
            pl.BlockSpec((1, N_pad), lambda b: (0, 0)),                # per-column valid length t_max
            pl.BlockSpec((N_pad, C_pad), lambda b: (0, 0)),            # fc weight (resident, bf16)
            pl.BlockSpec((1, C_pad), lambda b: (0, 0)),                # fc bias
        ],
        out_specs=pl.BlockSpec((B_BLK, C_pad), lambda b: (b, 0)),
        compiler_params=pltpu.CompilerParams(
            dimension_semantics=("parallel",),
            vmem_limit_bytes=48 * 1024 * 1024),                        # v7x-safe (64 MiB physical)
    )(x_in, w_stack, cb, tmax, fcw, fcb)

    return out[:B, :C]


def textcnn_reference(x_emb, conv_ws, conv_bs, fc_w, fc_b, filter_sizes):
    """Pure-JAX f32 reference mirroring the PyTorch forward (eval mode)."""
    B, S, E = x_emb.shape
    pooled = []
    for (w, b, k) in zip(conv_ws, conv_bs, filter_sizes):
        T = S - k + 1
        acc = jnp.zeros((B, T, w.shape[-1]), jnp.float32)
        for i in range(k):
            acc = acc + jnp.einsum('bte,ef->btf', x_emb[:, i:i + T, :], w[i])
        act = jnp.maximum(acc + b[None, :, :], 0.0)
        pooled.append(jnp.max(act, axis=1))
    feats = jnp.concatenate(pooled, axis=-1)
    return feats @ fc_w + fc_b


if __name__ == "__main__":
    # Small config consistent with MixTextCNN.__init__
    n_vocab = 50
    embed = 32
    seq_len = 16
    batch = 4
    num_filters = 8
    filter_sizes = (2, 3, 4)
    num_classes = 5

    key = jax.random.PRNGKey(0)
    k_emb, k_tok, *k_conv = jax.random.split(key, 2 + 2 * len(filter_sizes) + 2)
    k_fc_w, k_fc_b = k_conv[-2], k_conv[-1]
    k_conv = k_conv[:-2]

    # Embedding table (padding_idx=1 row zeroed, as in nn.Embedding(padding_idx=1)).
    emb_table = 0.1 * jax.random.normal(k_emb, (n_vocab, embed), jnp.float32)
    emb_table = emb_table.at[1].set(0.0)

    # Token ids.
    tokens = jax.random.randint(k_tok, (batch, seq_len), 0, n_vocab)

    # Conv2d(1, num_filters, (k, embed)) weights, stored as (k, embed, num_filters).
    conv_ws, conv_bs = [], []
    for i, k in enumerate(filter_sizes):
        conv_ws.append(0.1 * jax.random.normal(
            k_conv[2 * i], (k, embed, num_filters), jnp.float32))
        conv_bs.append(0.1 * jax.random.normal(
            k_conv[2 * i + 1], (1, num_filters), jnp.float32))

    # Linear(num_filters * len(filter_sizes), num_classes)
    fc_w = 0.1 * jax.random.normal(
        k_fc_w, (num_filters * len(filter_sizes), num_classes), jnp.float32)
    fc_b = 0.1 * jax.random.normal(k_fc_b, (1, num_classes), jnp.float32)

    # Embedding lookup (glue, plain JAX gather).
    x_emb = emb_table[tokens]  # (B, S, E)

    # TODO(synk): mix=True branch depends on an external `interleave` helper
    # not defined in the reference module; only the mix=False path is implemented.

    out = textcnn_forward(x_emb, conv_ws, conv_bs, fc_w, fc_b, filter_sizes)
    out = jax.block_until_ready(out)

    ref = textcnn_reference(x_emb, conv_ws, conv_bs, fc_w, fc_b, filter_sizes)
    assert out.shape == (batch, num_classes)
    # Tolerance relaxed vs. pure-f32: x is streamed in bf16 and both matmuls run
    # on the bf16 MXU path with f32 accumulation (intentional).
    assert jnp.allclose(out, ref, atol=1e-2, rtol=1e-2), "mismatch vs reference"

    print("KERNEL_OK")
</pallas_src>

<mosaic_0001>
module attributes {stable_mosaic.version = 11 : i64} {
  func.func @kernel(%arg0: i32, %arg1: memref<128x32xbf16, #tpu.memory_space<vmem>>, %arg2: memref<4x32x128xbf16, #tpu.memory_space<vmem>>, %arg3: memref<1x128xf32, #tpu.memory_space<vmem>>, %arg4: memref<1x128xi32, #tpu.memory_space<vmem>>, %arg5: memref<128x128xbf16, #tpu.memory_space<vmem>>, %arg6: memref<1x128xf32, #tpu.memory_space<vmem>>, %arg7: memref<8x128xf32, #tpu.memory_space<vmem>>) attributes {dimension_semantics = [#tpu.dimension_semantics<parallel>], iteration_bounds = array<i64: 1>, scalar_prefetch = 0 : i64, scratch_operands = 0 : i64, tpu.core_type = #tpu.core_type<tc>, window_params = [{transform_indices = @transform_0, window_bounds = array<i64: 128, 32>}, {pipeline_mode = #tpu.pipeline_mode<synchronous>, transform_indices = @transform_1, window_bounds = array<i64: 4, 32, 128>}, {pipeline_mode = #tpu.pipeline_mode<synchronous>, transform_indices = @transform_2, window_bounds = array<i64: 1, 128>}, {pipeline_mode = #tpu.pipeline_mode<synchronous>, transform_indices = @transform_3, window_bounds = array<i64: 1, 128>}, {pipeline_mode = #tpu.pipeline_mode<synchronous>, transform_indices = @transform_4, window_bounds = array<i64: 128, 128>}, {pipeline_mode = #tpu.pipeline_mode<synchronous>, transform_indices = @transform_5, window_bounds = array<i64: 1, 128>}, {transform_indices = @transform_6, window_bounds = array<i64: 8, 128>}]} {
    %c0 = arith.constant 0 : index
    %c0_0 = arith.constant 0 : index
    %0 = vector.load %arg1[%c0, %c0_0] : memref<128x32xbf16, #tpu.memory_space<vmem>>, vector<128x32xbf16>
    %1 = arith.extf %0 : vector<128x32xbf16> to vector<128x32xf32>
    %cst = arith.constant 0.000000e+00 : f32
    %2 = vector.broadcast %cst : f32 to vector<128x128xf32>
    %3 = arith.truncf %1 : vector<128x32xf32> to vector<128x32xbf16>
    %c0_1 = arith.constant 0 : index
    %c0_2 = arith.constant 0 : index
    %c0_3 = arith.constant 0 : index
    %4 = vector.load %arg2[%c0_1, %c0_2, %c0_3] : memref<4x32x128xbf16, #tpu.memory_space<vmem>>, vector<1x32x128xbf16>
    %5 = vector.shape_cast %4 : vector<1x32x128xbf16> to vector<32x128xbf16>
    %cst_4 = arith.constant dense<0.000000e+00> : vector<128x128xf32>
    %6 = tpu.matmul %3, %5, %cst_4 {dimension_numbers = #tpu.dot_dimension_numbers<[1], [0], [0], [1], [0, 0, 1, 1], [], []>} : vector<128x32xbf16>, vector<32x128xbf16>, vector<128x128xf32> -> vector<128x128xf32>
    %7 = arith.addf %2, %6 : vector<128x128xf32>
    %c127_i32 = arith.constant 127 : i32
    %8 = tpu.dynamic_rotate %1 by %c127_i32 dim 0 : vector<128x32xf32>, i32 -> vector<128x32xf32>
    %9 = arith.truncf %8 : vector<128x32xf32> to vector<128x32xbf16>
    %c1 = arith.constant 1 : index
    %c0_5 = arith.constant 0 : index
    %c0_6 = arith.constant 0 : index
    %10 = vector.load %arg2[%c1, %c0_5, %c0_6] : memref<4x32x128xbf16, #tpu.memory_space<vmem>>, vector<1x32x128xbf16>
    %11 = vector.shape_cast %10 : vector<1x32x128xbf16> to vector<32x128xbf16>
    %cst_7 = arith.constant dense<0.000000e+00> : vector<128x128xf32>
    %12 = tpu.matmul %9, %11, %cst_7 {dimension_numbers = #tpu.dot_dimension_numbers<[1], [0], [0], [1], [0, 0, 1, 1], [], []>} : vector<128x32xbf16>, vector<32x128xbf16>, vector<128x128xf32> -> vector<128x128xf32>
    %13 = arith.addf %7, %12 : vector<128x128xf32>
    %c126_i32 = arith.constant 126 : i32
    %14 = tpu.dynamic_rotate %1 by %c126_i32 dim 0 : vector<128x32xf32>, i32 -> vector<128x32xf32>
    %15 = arith.truncf %14 : vector<128x32xf32> to vector<128x32xbf16>
    %c2 = arith.constant 2 : index
    %c0_8 = arith.constant 0 : index
    %c0_9 = arith.constant 0 : index
    %16 = vector.load %arg2[%c2, %c0_8, %c0_9] : memref<4x32x128xbf16, #tpu.memory_space<vmem>>, vector<1x32x128xbf16>
    %17 = vector.shape_cast %16 : vector<1x32x128xbf16> to vector<32x128xbf16>
    %cst_10 = arith.constant dense<0.000000e+00> : vector<128x128xf32>
    %18 = tpu.matmul %15, %17, %cst_10 {dimension_numbers = #tpu.dot_dimension_numbers<[1], [0], [0], [1], [0, 0, 1, 1], [], []>} : vector<128x32xbf16>, vector<32x128xbf16>, vector<128x128xf32> -> vector<128x128xf32>
    %19 = arith.addf %13, %18 : vector<128x128xf32>
    %c125_i32 = arith.constant 125 : i32
    %20 = tpu.dynamic_rotate %1 by %c125_i32 dim 0 : vector<128x32xf32>, i32 -> vector<128x32xf32>
    %21 = arith.truncf %20 : vector<128x32xf32> to vector<128x32xbf16>
    %c3 = arith.constant 3 : index
    %c0_11 = arith.constant 0 : index
    %c0_12 = arith.constant 0 : index
    %22 = vector.load %arg2[%c3, %c0_11, %c0_12] : memref<4x32x128xbf16, #tpu.memory_space<vmem>>, vector<1x32x128xbf16>
    %23 = vector.shape_cast %22 : vector<1x32x128xbf16> to vector<32x128xbf16>
    %cst_13 = arith.constant dense<0.000000e+00> : vector<128x128xf32>
    %24 = tpu.matmul %21, %23, %cst_13 {dimension_numbers = #tpu.dot_dimension_numbers<[1], [0], [0], [1], [0, 0, 1, 1], [], []>} : vector<128x32xbf16>, vector<32x128xbf16>, vector<128x128xf32> -> vector<128x128xf32>
    %25 = arith.addf %19, %24 : vector<128x128xf32>
    %26 = tpu.iota {dimensions = array<i32: 0>} : vector<128x1xi32>
    %c15_i32 = arith.constant 15 : i32
    %27 = vector.broadcast %c15_i32 : i32 to vector<128x1xi32>
    %28 = arith.andi %26, %27 : vector<128x1xi32>
    %c0_14 = arith.constant 0 : index
    %c0_15 = arith.constant 0 : index
    %29 = vector.load %arg3[%c0_14, %c0_15] : memref<1x128xf32, #tpu.memory_space<vmem>>, vector<1x128xf32>
    %30 = vector.broadcast %29 : vector<1x128xf32> to vector<128x128xf32>
    %31 = arith.addf %25, %30 : vector<128x128xf32>
    %cst_16 = arith.constant 0.000000e+00 : f32
    %32 = vector.broadcast %cst_16 : f32 to vector<128x128xf32>
    %33 = arith.maximumf %31, %32 : vector<128x128xf32>
    %c0_17 = arith.constant 0 : index
    %c0_18 = arith.constant 0 : index
    %34 = vector.load %arg4[%c0_17, %c0_18] : memref<1x128xi32, #tpu.memory_space<vmem>>, vector<1x128xi32>
    %35 = vector.broadcast %28 : vector<128x1xi32> to vector<128x128xi32>
    %36 = vector.broadcast %34 : vector<1x128xi32> to vector<128x128xi32>
    %37 = arith.cmpi slt, %35, %36 : vector<128x128xi32>
    %cst_19 = arith.constant 0.000000e+00 : f32
    %38 = vector.broadcast %cst_19 : f32 to vector<128x128xf32>
    %39 = arith.select %37, %33, %38 : vector<128x128xi1>, vector<128x128xf32>
    %40 = vector.shape_cast %39 : vector<128x128xf32> to vector<8x16x128xf32>
    %cst_20 = arith.constant dense<0xFF800000> : vector<8x128xf32>
    %41 = vector.multi_reduction <maximumf>, %40, %cst_20 [1] : vector<8x16x128xf32> to vector<8x128xf32>
    %42 = arith.truncf %41 : vector<8x128xf32> to vector<8x128xbf16>
    %c0_21 = arith.constant 0 : index
    %c0_22 = arith.constant 0 : index
    %43 = vector.load %arg5[%c0_21, %c0_22] : memref<128x128xbf16, #tpu.memory_space<vmem>>, vector<128x128xbf16>
    %cst_23 = arith.constant dense<0.000000e+00> : vector<8x128xf32>
    %44 = tpu.matmul %42, %43, %cst_23 {dimension_numbers = #tpu.dot_dimension_numbers<[1], [0], [0], [1], [0, 0, 1, 1], [], []>} : vector<8x128xbf16>, vector<128x128xbf16>, vector<8x128xf32> -> vector<8x128xf32>
    %c0_24 = arith.constant 0 : index
    %c0_25 = arith.constant 0 : index
    %45 = vector.load %arg6[%c0_24, %c0_25] : memref<1x128xf32, #tpu.memory_space<vmem>>, vector<1x128xf32>
    %46 = vector.broadcast %45 : vector<1x128xf32> to vector<8x128xf32>
    %47 = arith.addf %44, %46 : vector<8x128xf32>
    %c0_26 = arith.constant 0 : index
    %c0_27 = arith.constant 0 : index
    %48 = vector.load %arg7[%c0_26, %c0_27] : memref<8x128xf32, #tpu.memory_space<vmem>>, vector<8x128xf32>
    tpu.vector_store %arg7[%c0_26, %c0_27], %47 {strides = array<i32>} : memref<8x128xf32, #tpu.memory_space<vmem>>, vector<8x128xf32>,
    return
  }
  func.func @transform_0(%arg0: i32) -> (i32, i32) {
    %c0_i32 = arith.constant 0 : i32
    %c0_i32_0 = arith.constant 0 : i32
    return %arg0, %c0_i32 : i32, i32
  }
  func.func @transform_1(%arg0: i32) -> (i32, i32, i32) {
    %c0_i32 = arith.constant 0 : i32
    %c0_i32_0 = arith.constant 0 : i32
    %c0_i32_1 = arith.constant 0 : i32
    %c0_i32_2 = arith.constant 0 : i32
    return %c0_i32, %c0_i32_0, %c0_i32_1 : i32, i32, i32
  }
  func.func @transform_2(%arg0: i32) -> (i32, i32) {
    %c0_i32 = arith.constant 0 : i32
    %c0_i32_0 = arith.constant 0 : i32
    %c0_i32_1 = arith.constant 0 : i32
    return %c0_i32, %c0_i32_0 : i32, i32
  }
  func.func @transform_3(%arg0: i32) -> (i32, i32) {
    %c0_i32 = arith.constant 0 : i32
    %c0_i32_0 = arith.constant 0 : i32
    %c0_i32_1 = arith.constant 0 : i32
    return %c0_i32, %c0_i32_0 : i32, i32
  }
  func.func @transform_4(%arg0: i32) -> (i32, i32) {
    %c0_i32 = arith.constant 0 : i32
    %c0_i32_0 = arith.constant 0 : i32
    %c0_i32_1 = arith.constant 0 : i32
    return %c0_i32, %c0_i32_0 : i32, i32
  }
  func.func @transform_5(%arg0: i32) -> (i32, i32) {
    %c0_i32 = arith.constant 0 : i32
    %c0_i32_0 = arith.constant 0 : i32
    %c0_i32_1 = arith.constant 0 : i32
    return %c0_i32, %c0_i32_0 : i32, i32
  }
  func.func @transform_6(%arg0: i32) -> (i32, i32) {
    %c0_i32 = arith.constant 0 : i32
    %c0_i32_0 = arith.constant 0 : i32
    return %arg0, %c0_i32 : i32, i32
  }
}

</mosaic_0001>

<bundles_post_ra>
// kernel: tpu_custom_call.1
= control target key start
LH: loop header
LB: loop body
LE: loop exit
PB: predicated region body
PF: predicated region fallthrough
CT: control target
= control target key end

     0   :  { %11 = vsyncpa [#allocation3], 0  ;;  %s1989_s0 = inlined_call_operand.vmem [shape: bf16[128,32], index: 0, kind: input, shape index: {}]   ;;  %s1990_s1 = inlined_call_operand.vmem [shape: bf16[4,32,128], index: 1, kind: input, shape index: {}]   ;;  %s1991_s2 = inlined_call_operand.vmem [shape: f32[1,128], index: 2, kind: input, shape index: {}]   ;;  %s1992_s3 = inlined_call_operand.vmem [shape: s32[1,128], index: 3, kind: input, shape index: {}]   ;;  %s1993_s4 = inlined_call_operand.hbm [shape: bf16[128,128], index: 4, kind: input, shape index: {}]   ;;  %s1994_s5 = inlined_call_operand.vmem [shape: f32[1,128], index: 5, kind: input, shape index: {}]   ;;  %s1995_s6 = inlined_call_operand.hbm [shape: f32[8,128], index: 6, kind: output, shape index: {}]  }
   0x1   :  { %12 = vsyncpa [#allocation4], 0  ;;  %s1452_s21 = smov [#allocation2]  }
   0x2   :  { %s26_s22 = sshll.u32 %s1452_s21, 4  ;;  %s27_s22 = int_to_ptr.vmem [resolvable:$true] %s26_s22 }
   0x3   :  { %s1416_s23 = scalar_lea.vmem %s27_s22, 1024  ;;  %p1421_p1 = scmp.lt.s32.totalorder %s27_s22, %s27_s22 }
   0x4   :  { %p1417_p0 = scmp.ne.s32.totalorder %s27_s22, %s1416_s23  ;;  %p1422_p2 = scmp.lt.s32.totalorder %s1416_s23, %s1416_s23 }
   0x6   :  { %p1423_p3 = por %p1422_p2, %p1421_p1 }
   0x8   :  { %p1424_p4 = pnand %p1423_p3, %p1417_p0 }
   0xa   :  { %1427 = shalt.err (!%p1424_p4)
}
   0xb   :  { %s1453_s24 = smov 64   ;;  %s1454_s25 = smov 4  }
   0xc   :  { %32 = dma.hbm_to_vmem [thread:$0]  %s1993_s4, 1024, %s27_s22, [#allocation3], %s1453_s24, %s1453_s24, %s1454_s25  }
   0xd   :  { %1448 = dma.done.wait [#allocation3], 1024  }
   0xe   :  { %1449 = vsyncadd [#allocation3], 4294966272  ;;  %v91_v0 = vlaneseq  ;;  %v1376_v1 = vld [vmem:[%s1990_s1 + $0x18] sm:$0xff]   ;;  %v1377_v2 = vld [vmem:[%s1990_s1 + $0x8] sm:$0xff]   ;;  %vm135_vm0 = vcmask 261120   ;;  %vm1456_vm4 = vmmov 0  }
   0xf   :  { %1270 = vmatprep.subr.bf16.mxu0 %v1376_v1  ;;  %v1378_v3 = vld [vmem:[%s1990_s1 + $0x10] sm:$0xff]   ;;  %1290 = vmatprep.subr.bf16.mxu1 %v1377_v2  ;;  %v1379_v5 = vld [vmem:[%s1990_s1] sm:$0xff]   ;;  %v41_v7 = vld [vmem:[%s1989_s0 + $0x8] sm:$0xff]   ;;  %s1457_s12 = smov [#allocation5]  }
  0x10   :  { %v1505_v4 = vshrl.u32 %v91_v0, 7  ;;  %1271 = vmatpush3.bf16.msra.mxu0 %v1376_v1  ;;  %1291 = vmatpush3.bf16.msra.mxu1 %v1377_v2  ;;  %v39_v6 = vld [vmem:[%s1989_s0] sm:$0xff]   ;;  %v43_v8 = vld [vmem:[%s1989_s0 + $0x10] sm:$0xff]   ;;  %v1523_v11 = vunpack.c.l.bf16 %v41_v7  ;;  %v1382_v12 = vld [vmem:[%s1990_s1 + $0x28] sm:$0xff]   ;;  %v1529_v13 = vunpack.c.h.bf16 %v41_v7  ;;  %s1141_s13 = sshll.u32 %s1457_s12, 4  ;;  %s1142_s13 = int_to_ptr.vmem [resolvable:$true] %s1141_s13 }
  0x11   :  { %1272 = vmatprep.subr.bf16.mxu0 %v1378_v3  ;;  %1292 = vmatprep.subr.bf16.mxu1 %v1379_v5  ;;  %v1519_v9 = vunpack.c.l.bf16 %v39_v6  ;;  %v1521_v10 = vunpack.c.h.bf16 %v39_v6  ;;  %v1531_v14 = vunpack.c.l.bf16 %v43_v8  ;;  %v1383_v15 = vld [vmem:[%s1990_s1 + $0x38] sm:$0xff]   ;;  %v1536_v16 = vunpack.c.h.bf16 %v43_v8  ;;  %v47_v23 = vld [vmem:[%s1989_s0 + $0x20] sm:$0xff]   ;;  %v49_v28 = vld [vmem:[%s1989_s0 + $0x28] sm:$0xff]   ;;  %s1428_s14 = scalar_lea.vmem %s1142_s13, 128  ;;  %p1433_p6 = scmp.lt.s32.totalorder %s1142_s13, %s1142_s13 }
  0x12   :  { %vm93_vm1 = vcmp.lt.s32.totalorder %v1505_v4, 7  ;;  %v77_v19 = vrot.slane %v1523_v11, 1  ;;  %1294 = vmatprep.mubr.msk.bf16.mxu1 %vm135_vm0, %v39_v6  ;;  %v45_v20 = vld [vmem:[%s1989_s0 + $0x18] sm:$0xff]   ;;  %v78_v21 = vrot.slane %v1529_v13, 1  ;;  %v1389_v33 = vld [vmem:[%s1990_s1 + $0x30] sm:$0xff]   ;;  %v1575_v37 = vunpack.c.l.bf16 %v47_v23  ;;  %v1388_v38 = vld [vmem:[%s1990_s1 + $0x20] sm:$0xff]   ;;  %p1429_p5 = scmp.ne.s32.totalorder %s1142_s13, %s1428_s14  ;;  %p1434_p7 = scmp.lt.s32.totalorder %s1428_s14, %s1428_s14 }
  0x13   :  { %v75_v17 = vrot.slane %v1519_v9, 1  ;;  %v76_v18 = vrot.slane %v1521_v10, 1  ;;  %v79_v22 = vrot.slane %v1531_v14, 1  ;;  %v1556_v26 = vunpack.c.l.bf16 %v45_v20  ;;  %v51_v42 = vld [vmem:[%s1989_s0 + $0x30] sm:$0xff]   ;;  %v53_v46 = vld [vmem:[%s1989_s0 + $0x38] sm:$0xff]  }
  0x14   :  { %1273 = vmatpush3.bf16.msra.mxu0 %v1378_v3  ;;  %1293 = vmatpush3.bf16.msra.mxu1 %v1379_v5  ;;  %v80_v27 = vrot.slane %v1536_v16, 1  ;;  %v106_v31 = vsel %vm93_vm1, %v77_v19, %v78_v21  ;;  %v1566_v32 = vunpack.c.h.bf16 %v45_v20  ;;  %v1582_v40 = vunpack.c.h.bf16 %v47_v23  ;;  %p1435_p8 = por %p1434_p7, %p1433_p6 }
  0x15   :  { %1310 = vmatprep.subr.bf16.mxu0 %v1382_v12  ;;  %v107_v24 = vsel %vm93_vm1, %v76_v18, %v77_v19  ;;  %v108_v25 = vsel %vm93_vm1, %v75_v17, %v76_v18  ;;  %1330 = vmatprep.subr.bf16.mxu1 %v1383_v15  ;;  %v105_v30 = vsel %vm93_vm1, %v78_v21, %v79_v22  ;;  %v81_v35 = vrot.slane %v1556_v26, 1 }
  0x16   :  { %v110_v29 = vpack.c.bf16 %v107_v24, %v108_v25  ;;  %v111_v34 = vpack.c.bf16 %v105_v30, %v106_v31  ;;  %v104_v36 = vsel %vm93_vm1, %v79_v22, %v80_v27  ;;  %v82_v39 = vrot.slane %v1566_v32, 1  ;;  %p1436_p9 = pnand %p1435_p8, %p1429_p5 }
  0x17   :  { %1295 = vmatmul.mubr.msk.bf16.vlgmr.msra.gmra.mxu1 %vm135_vm0, %v41_v7  ;;  %v1584_v41 = vunpack.c.l.bf16 %v49_v28  ;;  %v103_v43 = vsel %vm93_vm1, %v80_v27, %v81_v35  ;;  %v83_v44 = vrot.slane %v1575_v37, 1  ;;  %v1594_v45 = vunpack.c.h.bf16 %v49_v28 }
  0x18   :  { %1274 = vmatprep.mubr.msk.bf16.mxu0 %vm135_vm0, %v110_v29  ;;  %1331 = vmatpush3.bf16.msra.mxu1 %v1383_v15  ;;  %v112_v47 = vpack.c.bf16 %v103_v43, %v104_v36  ;;  %v102_v48 = vsel %vm93_vm1, %v81_v35, %v82_v39  ;;  %v84_v49 = vrot.slane %v1582_v40, 1  ;;  %v1605_v52 = vunpack.c.l.bf16 %v51_v42 }
  0x19   :  { %1275 = vmatmul.mubr.msk.bf16.vlgmr.msra.gmra.mxu0 %vm135_vm0, %v111_v34  ;;  %1298 = vmatprep.mubr.msk.bf16.mxu1 %vm135_vm0, %v43_v8  ;;  %v85_v50 = vrot.slane %v1584_v41, 1  ;;  %v101_v51 = vsel %vm93_vm1, %v82_v39, %v83_v44  ;;  %v1612_v55 = vunpack.c.h.bf16 %v51_v42  ;;  %v1614_v57 = vunpack.c.l.bf16 %v53_v46 }
  0x1a   :  { %1311 = vmatpush3.bf16.msra.mxu0 %v1382_v12  ;;  %1332 = vmatprep.subr.bf16.mxu1 %v1389_v33  ;;  %v100_v54 = vsel %vm93_vm1, %v83_v44, %v84_v49  ;;  %v113_v56 = vpack.c.bf16 %v101_v51, %v102_v48  ;;  %v86_v59 = vrot.slane %v1594_v45, 1  ;;  %v87_v60 = vrot.slane %v1605_v52, 1 }
  0x1b   :  { %1312 = vmatprep.subr.bf16.mxu0 %v1388_v38  ;;  %1278 = vmatprep.mubr.msk.bf16.mxu0 %vm135_vm0, %v112_v47  ;;  %v99_v53 = vsel %vm93_vm1, %v84_v49, %v85_v50  ;;  %v88_v61 = vrot.slane %v1612_v55, 1  ;;  %v89_v62 = vrot.slane %v1614_v57, 1  ;;  %v1628_v1 = vunpack.c.h.bf16 %v53_v46 }
  0x1c   :  { %1333 = vmatpush3.bf16.msra.mxu1 %v1389_v33  ;;  %v114_v58 = vpack.c.bf16 %v99_v53, %v100_v54  ;;  %v97_v63 = vsel %vm93_vm1, %v86_v59, %v87_v60  ;;  %v98_v0 = vsel %vm93_vm1, %v85_v50, %v86_v59  ;;  %v625_v6 = vrot.slane %v1519_v9, 3 }
  0x1d   :  { %v95_v2 = vsel %vm93_vm1, %v88_v61, %v89_v62  ;;  %v96_v3 = vsel %vm93_vm1, %v87_v60, %v88_v61  ;;  %v115_v5 = vpack.c.bf16 %v97_v63, %v98_v0  ;;  %v626_v7 = vrot.slane %v1521_v10, 3 }
  0x1e   :  { %1313 = vmatpush3.bf16.msra.mxu0 %v1388_v38  ;;  %v627_v8 = vrot.slane %v1523_v11, 3  ;;  %v116_v12 = vpack.c.bf16 %v95_v2, %v96_v3  ;;  %v90_v15 = vrot.slane %v1628_v1, 1  ;;  %vm641_vm2 = vcmp.lt.s32.totalorder %v1505_v4, 5 }
  0x1f   :  { %1299 = vmatmul.mubr.msk.bf16.gmra.mxu1 %vm135_vm0, %v45_v20  ;;  %v430_v18 = vrot.slane %v1519_v9, 2  ;;  %v431_v19 = vrot.slane %v1521_v10, 2  ;;  %v432_v20 = vrot.slane %v1523_v11, 2  ;;  %vm446_vm3 = vcmp.lt.s32.totalorder %v1505_v4, 6  ;;  %v1395_v9 = vld [vmem:[#allocation2 + $0x20] sm:$0xff]  }
  0x20   :  { %1302 = vmatprep.mubr.msk.bf16.mxu1 %vm135_vm0, %v47_v23  ;;  %v655_v21 = vsel %vm641_vm2, %v626_v7, %v627_v8  ;;  %v656_v22 = vsel %vm641_vm2, %v625_v6, %v626_v7  ;;  %v94_v10 = vsel %vm93_vm1, %v89_v62, %v90_v15  ;;  %v109_v11 = vsel %vm93_vm1, %v90_v15, %v75_v17 }
  0x21   :  { %1279 = vmatmul.mubr.msk.bf16.gmra.mxu0 %vm135_vm0, %v113_v56  ;;  %v460_v23 = vsel %vm446_vm3, %v431_v19, %v432_v20  ;;  %v461_v24 = vsel %vm446_vm3, %v430_v18, %v431_v19  ;;  %v629_v25 = vrot.slane %v1531_v14, 3  ;;  %v628_v27 = vrot.slane %v1529_v13, 3 }
  0x22   :  { %1282 = vmatprep.mubr.msk.bf16.mxu0 %vm135_vm0, %v114_v58  ;;  %v117_v29 = vpack.c.bf16 %v109_v11, %v94_v10  ;;  %v630_v30 = vrot.slane %v1536_v16, 3  ;;  %v631_v31 = vrot.slane %v1556_v26, 3  ;;  %v434_v17 = vrot.slane %v1531_v14, 2 }
  0x23   :  { %v433_v33 = vrot.slane %v1529_v13, 2  ;;  %v463_v34 = vpack.c.bf16 %v460_v23, %v461_v24  ;;  %v435_v35 = vrot.slane %v1536_v16, 2  ;;  %v436_v36 = vrot.slane %v1556_v26, 2 }
  0x24   :  { %v654_v38 = vsel %vm641_vm2, %v627_v8, %v628_v27  ;;  %v653_v39 = vsel %vm641_vm2, %v628_v27, %v629_v25  ;;  %v651_v13 = vsel %vm641_vm2, %v630_v30, %v631_v31  ;;  %v652_v14 = vsel %vm641_vm2, %v629_v25, %v630_v30 }
  0x25   :  { %v459_v16 = vsel %vm446_vm3, %v432_v20, %v433_v33  ;;  %v458_v26 = vsel %vm446_vm3, %v433_v33, %v434_v17  ;;  %v456_v43 = vsel %vm446_vm3, %v435_v35, %v436_v36  ;;  %v457_v44 = vsel %vm446_vm3, %v434_v17, %v435_v35 }
  0x26   :  { %v632_v47 = vrot.slane %v1566_v32, 3  ;;  %v633_v48 = vrot.slane %v1575_v37, 3  ;;  %v464_v49 = vpack.c.bf16 %v458_v26, %v459_v16  ;;  %v634_v50 = vrot.slane %v1582_v40, 3  ;;  %v1398_v16 = vld [vmem:[#allocation2 + $0x8] sm:$0xff]   ;;  %v1399_v26 = vld [vmem:[#allocation2] sm:$0xff]  }
  0x27   :  { %1303 = vmatmul.mubr.msk.bf16.gmra.mxu1 %vm135_vm0, %v49_v28  ;;  %v658_v28 = vpack.c.bf16 %v655_v21, %v656_v22  ;;  %v635_v51 = vrot.slane %v1584_v41, 3  ;;  %v465_v53 = vpack.c.bf16 %v456_v43, %v457_v44  ;;  %v437_v54 = vrot.slane %v1566_v32, 2 }
  0x28   :  { %1306 = vmatprep.mubr.msk.bf16.mxu1 %vm135_vm0, %v51_v42  ;;  %v659_v42 = vpack.c.bf16 %v653_v39, %v654_v38  ;;  %v438_v56 = vrot.slane %v1575_v37, 2  ;;  %v439_v58 = vrot.slane %v1582_v40, 2  ;;  %v440_v59 = vrot.slane %v1584_v41, 2  ;;  %v1392_v38 = vld [vmem:[#allocation2 + $0x38] sm:$0xff]   ;;  %v1393_v39 = vld [vmem:[#allocation2 + $0x30] sm:$0xff]  }
  0x29   :  { %1283 = vmatmul.mubr.msk.bf16.gmra.mxu0 %vm135_vm0, %v115_v5  ;;  %v649_v60 = vsel %vm641_vm2, %v632_v47, %v633_v48  ;;  %v650_v61 = vsel %vm641_vm2, %v631_v31, %v632_v47  ;;  %v647_v32 = vsel %vm641_vm2, %v634_v50, %v635_v51  ;;  %v648_v37 = vsel %vm641_vm2, %v633_v48, %v634_v50 }
  0x2a   :  { %1286 = vmatprep.mubr.msk.bf16.mxu0 %vm135_vm0, %v116_v12  ;;  %v454_v40 = vsel %vm446_vm3, %v437_v54, %v438_v56  ;;  %v455_v41 = vsel %vm446_vm3, %v436_v36, %v437_v54  ;;  %v661_v62 = vpack.c.bf16 %v649_v60, %v650_v61  ;;  %v452_v63 = vsel %vm446_vm3, %v439_v58, %v440_v59 }
  0x2b   :  { %v453_v0 = vsel %vm446_vm3, %v438_v56, %v439_v58  ;;  %v662_v2 = vpack.c.bf16 %v647_v32, %v648_v37  ;;  %v636_v3 = vrot.slane %v1594_v45, 3  ;;  %v637_v5 = vrot.slane %v1605_v52, 3 }
  0x2c   :  { %v466_v7 = vpack.c.bf16 %v454_v40, %v455_v41  ;;  %v638_v8 = vrot.slane %v1612_v55, 3  ;;  %v639_v12 = vrot.slane %v1614_v57, 3  ;;  %v467_v15 = vpack.c.bf16 %v452_v63, %v453_v0 }
  0x2d   :  { %v441_v19 = vrot.slane %v1594_v45, 2  ;;  %v442_v20 = vrot.slane %v1605_v52, 2  ;;  %v443_v21 = vrot.slane %v1612_v55, 2  ;;  %v444_v22 = vrot.slane %v1614_v57, 2 }
  0x2e   :  { %v645_v10 = vsel %vm641_vm2, %v636_v3, %v637_v5  ;;  %v646_v11 = vsel %vm641_vm2, %v635_v51, %v636_v3  ;;  %v643_v45 = vsel %vm641_vm2, %v638_v8, %v639_v12  ;;  %v644_v52 = vsel %vm641_vm2, %v637_v5, %v638_v8 }
  0x2f   :  { %1307 = vmatmul.mubr.msk.bf16.gmra.mxu1 %vm135_vm0, %v53_v46  ;;  %v660_v46 = vpack.c.bf16 %v651_v13, %v652_v14  ;;  %v450_v55 = vsel %vm446_vm3, %v441_v19, %v442_v20  ;;  %v451_v57 = vsel %vm446_vm3, %v440_v59, %v441_v19  ;;  %v663_v23 = vpack.c.bf16 %v645_v10, %v646_v11  ;;  %v1394_v13 = vld [vmem:[#allocation2 + $0x28] sm:$0xff]   ;;  %v1397_v14 = vld [vmem:[#allocation2 + $0x10] sm:$0xff]  }
  0x30   :  { %1334 = vmatprep.mubr.msk.bf16.mxu1 %vm135_vm0, %v658_v28  ;;  %v448_v24 = vsel %vm446_vm3, %v443_v21, %v444_v22  ;;  %v449_v25 = vsel %vm446_vm3, %v442_v20, %v443_v21  ;;  %v664_v27 = vpack.c.bf16 %v643_v45, %v644_v52  ;;  %v640_v28 = vrot.slane %v1628_v1, 3 }
  0x31   :  { %1287 = vmatmul.mubr.msk.bf16.gmra.mxu0 %vm135_vm0, %v117_v29  ;;  %v468_v29 = vpack.c.bf16 %v450_v55, %v451_v57  ;;  %v469_v30 = vpack.c.bf16 %v448_v24, %v449_v25  ;;  %v445_v31 = vrot.slane %v1628_v1, 2  ;;  %v821_v20 = vadd.s32 16, %v1505_v4 }
  0x32   :  { %1314 = vmatprep.mubr.msk.bf16.mxu0 %vm135_vm0, %v463_v34  ;;  %v642_v17 = vsel %vm641_vm2, %v639_v12, %v640_v28  ;;  %v657_v33 = vsel %vm641_vm2, %v640_v28, %v625_v6  ;;  %v1455_v6 = vmov 0.0   ;;  %v822_v21 = vadd.s32 24, %v1505_v4 }
  0x33   :  { %v447_v34 = vsel %vm446_vm3, %v444_v22, %v445_v31  ;;  %v462_v1 = vsel %vm446_vm3, %v445_v31, %v430_v18  ;;  %v665_v35 = vpack.c.bf16 %v657_v33, %v642_v17  ;;  %1350 = vmatprep.subr.bf16.mxu0 %v1455_v6  ;;  %v1396_v18 = vld [vmem:[#allocation2 + $0x18] sm:$0xff]   ;;  %v820_v11 = vadd.s32 8, %v1505_v4 }
  0x34   :  { %v470_v36 = vpack.c.bf16 %v462_v1, %v447_v34  ;;  %v837_v55 = vand.u32 15, %v821_v20  ;;  %v835_v28 = vand.u32 15, %v1505_v4  ;;  %v825_v17 = vadd.s32 48, %v1505_v4  ;;  %v1830_v1 = vld [vmem:[%s1991_s2] ss:$0 sm:$0xff] }
  0x35   :  { %v836_v31 = vand.u32 15, %v820_v11  ;;  %v1855_v20 = vadd.s32 64, %v1505_v4 }
  0x37   :  { %1335 = vmatmul.mubr.msk.bf16.vlgmr.msra.gmra.mxu1 %vm135_vm0, %v659_v42 }
  0x38   :  { %1338 = vmatprep.mubr.msk.bf16.mxu1 %vm135_vm0, %v660_v46 }
  0x39   :  { %1315 = vmatmul.mubr.msk.bf16.vlgmr.msra.gmra.mxu0 %vm135_vm0, %v464_v49 }
  0x3a   :  { %1318 = vmatprep.mubr.msk.bf16.mxu0 %vm135_vm0, %v465_v53  ;;  %1351 = vmatpush3.bf16.msra.mxu0 %v1392_v38 }
  0x3b   :  { %1352 = vmatprep.subr.bf16.mxu0 %v1455_v6 }
  0x3e   :  { %1353 = vmatpush3.bf16.msra.mxu0 %v1393_v39 }
  0x3f   :  { %1339 = vmatmul.mubr.msk.bf16.gmra.mxu1 %vm135_vm0, %v661_v62  ;;  %1354 = vmatprep.subr.bf16.mxu0 %v1455_v6 }
  0x40   :  { %1342 = vmatprep.mubr.msk.bf16.mxu1 %vm135_vm0, %v662_v2 }
  0x41   :  { %1319 = vmatmul.mubr.msk.bf16.gmra.mxu0 %vm135_vm0, %v466_v7 }
  0x42   :  { %1322 = vmatprep.mubr.msk.bf16.mxu0 %vm135_vm0, %v467_v15  ;;  %1355 = vmatpush3.bf16.msra.mxu0 %v1394_v13 }
  0x43   :  { %1356 = vmatprep.subr.bf16.mxu0 %v1455_v6 }
  0x46   :  { %1357 = vmatpush3.bf16.msra.mxu0 %v1395_v9  ;;  %v826_v9 = vadd.s32 56, %v1505_v4 }
  0x47   :  { %1343 = vmatmul.mubr.msk.bf16.gmra.mxu1 %vm135_vm0, %v663_v23  ;;  %1358 = vmatprep.subr.bf16.mxu0 %v1455_v6  ;;  %v838_v23 = vand.u32 15, %v822_v21 }
  0x48   :  { %1346 = vmatprep.mubr.msk.bf16.mxu1 %vm135_vm0, %v664_v27  ;;  %v1823_v27 = vld [vmem:[%s1992_s3] ss:$0 sm:$0xff] }
  0x49   :  { %1323 = vmatmul.mubr.msk.bf16.gmra.mxu0 %vm135_vm0, %v468_v29  ;;  %vm1834_vm5 = vcmp.lt.s32.totalorder %v837_v55, %v1823_v27  ;;  %vm1839_vm6 = vcmp.lt.s32.totalorder %v838_v23, %v1823_v27  ;;  %vm1845_vm7 = vcmp.lt.s32.totalorder %v835_v28, %v1823_v27  ;;  %vm1858_vm8 = vcmp.lt.s32.totalorder %v836_v31, %v1823_v27 }
  0x4a   :  { %1326 = vmatprep.mubr.msk.bf16.mxu0 %vm135_vm0, %v469_v30  ;;  %1359 = vmatpush3.bf16.msra.mxu0 %v1396_v18  ;;  %v830_v23 = vadd.s32 88, %v1505_v4 }
  0x4b   :  { %1360 = vmatprep.subr.bf16.mxu0 %v1455_v6 }
  0x4e   :  { %1361 = vmatpush3.bf16.msra.mxu0 %v1397_v14 }
  0x4f   :  { %1347 = vmatmul.mubr.msk.bf16.gmra.mxu1 %vm135_vm0, %v665_v35  ;;  %1362 = vmatprep.subr.bf16.mxu0 %v1455_v6 }
  0x51   :  { %1327 = vmatmul.mubr.msk.bf16.gmra.mxu0 %vm135_vm0, %v470_v36  ;;  %v823_v36 = vadd.s32 32, %v1505_v4 }
  0x52   :  { %1363 = vmatpush3.bf16.msra.mxu0 %v1398_v16  ;;  %1366 = vmatprep.mubr.msk.bf16.mxu0 %vm1456_vm4, %v1455_v6 }
  0x53   :  { %1364 = vmatprep.subr.bf16.mxu0 %v1455_v6 }
  0x56   :  { %1365 = vmatpush3.bf16.msra.mxu0 %v1399_v26 }
  0xd7   :  { %v1296_v42 = vpop.f32.mrf.mxu1 }
  0xd9   :  { %v1276_v43 = vpop.f32.mrf.mxu0  ;;  %v367_v44 = vpop.f32.mrf.mxu1 }
  0xda   :  { %v376_v45 = vadd.f32 %v1296_v42, %v1276_v43  ;;  %v824_v42 = vadd.s32 40, %v1505_v4 }
  0xdb   :  { %v194_v46 = vpop.f32.mrf.mxu0  ;;  %v1297_v47 = vpop.f32.mrf.mxu1 }
  0xdc   :  { %v368_v24 = vadd.f32 %v367_v44, %v194_v46 }
  0xdd   :  { %v1277_v48 = vpop.f32.mrf.mxu0  ;;  %v370_v49 = vpop.f32.mrf.mxu1 }
  0xde   :  { %v379_v33 = vadd.f32 %v1297_v47, %v1277_v48  ;;  %v841_v47 = vand.u32 15, %v825_v17  ;;  %v1852_v48 = vadd.s32 80, %v1505_v4 }
  0xdf   :  { %v197_v50 = vpop.f32.mrf.mxu0  ;;  %v1769_v51 = vpop.f32.mrf.mxu1 }
  0xe0   :  { %v371_v18 = vadd.f32 %v370_v49, %v197_v50  ;;  %vm1870_vm9 = vcmp.lt.s32.totalorder %v841_v47, %v1823_v27 }
  0xe1   :  { %v1771_v53 = vpop.f32.mrf.mxu0  ;;  %v1773_v54 = vpop.f32.mrf.mxu1 }
  0xe2   :  { %v392_v11 = vadd.f32 %v1769_v51, %v1771_v53 }
  0xe3   :  { %v1775_v56 = vpop.f32.mrf.mxu0  ;;  %v1777_v58 = vpop.f32.mrf.mxu1 }
  0xe5   :  { %v1779_v59 = vpop.f32.mrf.mxu0  ;;  %v1781_v60 = vpop.f32.mrf.mxu1 }
  0xe7   :  { %v1783_v61 = vpop.f32.mrf.mxu0  ;;  %v1785_v32 = vpop.f32.mrf.mxu1 }
  0xe9   :  { %v1787_v37 = vpop.f32.mrf.mxu0  ;;  %v1789_v40 = vpop.f32.mrf.mxu1 }
  0xea   :  { %v408_v47 = vadd.f32 %v1785_v32, %v1787_v37 }
  0xeb   :  { %v1791_v41 = vpop.f32.mrf.mxu0  ;;  %v1793_v62 = vpop.f32.mrf.mxu1 }
  0xec   :  { %v400_v16 = vadd.f32 %v1789_v40, %v1791_v41  ;;  %v832_v40 = vadd.s32 104, %v1505_v4 }
  0xed   :  { %v1795_v63 = vpop.f32.mrf.mxu0  ;;  %v1797_v0 = vpop.f32.mrf.mxu1 }
  0xef   :  { %v1799_v2 = vpop.f32.mrf.mxu0  ;;  %v1801_v3 = vpop.f32.mrf.mxu1 }
  0xf1   :  { %v1803_v5 = vpop.f32.mrf.mxu0  ;;  %v1805_v7 = vpop.f32.mrf.mxu1 }
  0xf3   :  { %v1807_v8 = vpop.f32.mrf.mxu0  ;;  %v1809_v12 = vpop.f32.mrf.mxu1 }
  0xf5   :  { %v1811_v15 = vpop.f32.mrf.mxu0  ;;  %v1813_v19 = vpop.f32.mrf.mxu1 }
  0xf7   :  { %v1817_v22 = vpop.f32.mrf.mxu0  ;;  %v1336_v10 = vpop.f32.mrf.mxu1 }
  0xf9   :  { %v1316_v52 = vpop.f32.mrf.mxu0  ;;  %v741_v57 = vpop.f32.mrf.mxu1 }
  0xfa   :  { %v611_v25 = vadd.f32 %v1316_v52, %v376_v45 }
  0xfb   :  { %v546_v29 = vpop.f32.mrf.mxu0  ;;  %v1337_v30 = vpop.f32.mrf.mxu1 }
  0xfc   :  { %v806_v34 = vadd.f32 %v1336_v10, %v611_v25  ;;  %v609_v35 = vadd.f32 %v546_v29, %v368_v24  ;;  %v839_v10 = vand.u32 15, %v823_v36  ;;  %v384_v24 = vadd.f32 %v1773_v54, %v1775_v56 }
  0xfd   :  { %v1317_v6 = vpop.f32.mrf.mxu0  ;;  %v744_v13 = vpop.f32.mrf.mxu1  ;;  %v840_v29 = vand.u32 15, %v824_v42  ;;  %v395_v54 = vadd.f32 %v1777_v58, %v1779_v59  ;;  %v846_v42 = vand.u32 15, %v830_v23 }
  0xfe   :  { %v804_v14 = vadd.f32 %v741_v57, %v609_v35  ;;  %v612_v26 = vadd.f32 %v1317_v6, %v379_v33  ;;  %v860_v43 = vadd.f32 %v1830_v1, %v806_v34  ;;  %v842_v57 = vand.u32 15, %v826_v9 }
  0xff   :  { %v549_v44 = vpop.f32.mrf.mxu0  ;;  %v1340_v46 = vpop.f32.mrf.mxu1  ;;  %v845_v33 = vand.u32 15, %v1852_v48  ;;  %v843_v34 = vand.u32 15, %v1855_v20  ;;  %v387_v6 = vadd.f32 %v1781_v60, %v1783_v61  ;;  %vm1882_vm10 = vcmp.lt.s32.totalorder %v839_v10, %v1823_v27 }
 0x100   :  { %v807_v49 = vadd.f32 %v1337_v30, %v612_v26  ;;  %v610_v50 = vadd.f32 %v549_v44, %v371_v18  ;;  %v858_v45 = vadd.f32 %v1830_v1, %v804_v14  ;;  %v876_v30 = vmax.f32 %v860_v43, 0.0 }
 0x101   :  { %v1320_v52 = vpop.f32.mrf.mxu0  ;;  %v757_v55 = vpop.f32.mrf.mxu1  ;;  %v828_v20 = vadd.s32 72, %v1505_v4  ;;  %vm1900_vm11 = vcmp.lt.s32.totalorder %v842_v57, %v1823_v27  ;;  %vm1905_vm12 = vcmp.lt.s32.totalorder %v840_v29, %v1823_v27  ;;  %v411_v57 = vadd.f32 %v1793_v62, %v1795_v63 }
 0x102   :  { %v861_v25 = vadd.f32 %v1830_v1, %v807_v49  ;;  %v805_v28 = vadd.f32 %v744_v13, %v610_v50  ;;  %v615_v31 = vadd.f32 %v1320_v52, %v392_v11  ;;  %v874_v13 = vmax.f32 %v858_v45, 0.0 }
 0x103   :  { %v562_v51 = vpop.f32.mrf.mxu0  ;;  %v1341_v53 = vpop.f32.mrf.mxu1  ;;  %v913_v60 = vsel %vm1834_vm5, %v876_v30, 0.0  ;;  %vm1915_vm13 = vcmp.lt.s32.totalorder %v846_v42, %v1823_v27  ;;  %vm1921_vm14 = vcmp.lt.s32.totalorder %v845_v33, %v1823_v27  ;;  %vm1926_vm15 = vcmp.lt.s32.totalorder %v843_v34, %v1823_v27 }
 0x104   :  { %v877_v56 = vmax.f32 %v861_v25, 0.0  ;;  %v859_v35 = vadd.f32 %v1830_v1, %v805_v28  ;;  %v613_v36 = vadd.f32 %v562_v51, %v384_v24  ;;  %v810_v9 = vadd.f32 %v1340_v46, %v615_v31 }
 0x105   :  { %v1321_v14 = vpop.f32.mrf.mxu0  ;;  %v760_v26 = vpop.f32.mrf.mxu1  ;;  %v911_v11 = vsel %vm1845_vm7, %v874_v13, 0.0  ;;  %v844_v31 = vand.u32 15, %v828_v20  ;;  %v403_v62 = vadd.f32 %v1797_v0, %v1799_v2  ;;  %vm1030_vm5 = vcmask 1041409  }
 0x106   :  { %v914_v58 = vsel %vm1839_vm6, %v877_v56, 0.0  ;;  %v875_v59 = vmax.f32 %v859_v35, 0.0  ;;  %v808_v43 = vadd.f32 %v757_v55, %v613_v36  ;;  %v616_v44 = vadd.f32 %v1321_v14, %v395_v54 }
 0x107   :  { %v864_v61 = vadd.f32 %v1830_v1, %v810_v9  ;;  %v565_v46 = vpop.f32.mrf.mxu0  ;;  %v1344_v48 = vpop.f32.mrf.mxu1  ;;  %v934_v32 = vmax.f32 %v913_v60, %v914_v58  ;;  %vm1945_vm0 = vcmp.lt.s32.totalorder %v844_v31, %v1823_v27  ;;  %vm1032_vm6 = vcmask 1042434  }
 0x108   :  { %v912_v49 = vsel %vm1858_vm8, %v875_v59, 0.0  ;;  %v862_v39 = vadd.f32 %v1830_v1, %v808_v43  ;;  %v811_v50 = vadd.f32 %v1341_v53, %v616_v44  ;;  %v614_v10 = vadd.f32 %v565_v46, %v387_v6 }
 0x109   :  { %v1324_v21 = vpop.f32.mrf.mxu0  ;;  %v773_v45 = vpop.f32.mrf.mxu1  ;;  %v880_v52 = vmax.f32 %v864_v61, 0.0  ;;  %v927_v25 = vmax.f32 %v911_v11, %v912_v49  ;;  %v935_v63 = vrot.slane %v934_v32, 4  ;;  %v833_v6 = vadd.s32 112, %v1505_v4 }
 0x10a   :  { %v865_v55 = vadd.f32 %v1830_v1, %v811_v50  ;;  %v809_v23 = vadd.f32 %v760_v26, %v614_v10  ;;  %v619_v24 = vadd.f32 %v1324_v21, %v408_v47  ;;  %v878_v51 = vmax.f32 %v862_v39, 0.0 }
 0x10b   :  { %v578_v28 = vpop.f32.mrf.mxu0  ;;  %v1345_v30 = vpop.f32.mrf.mxu1  ;;  %v917_v13 = vsel %vm1870_vm9, %v880_v52, 0.0  ;;  %v928_v26 = vrot.slane %v927_v25, 4  ;;  %v424_v47 = vadd.f32 %v1801_v3, %v1803_v5  ;;  %v936_v20 = vmax.f32 %v934_v32, %v935_v63 }
 0x10c   :  { %v881_v53 = vmax.f32 %v865_v55, 0.0  ;;  %v863_v54 = vadd.f32 %v1830_v1, %v809_v23  ;;  %v814_v56 = vadd.f32 %v1344_v48, %v619_v24  ;;  %v617_v35 = vadd.f32 %v578_v28, %v400_v16 }
 0x10d   :  { %v1325_v36 = vpop.f32.mrf.mxu0  ;;  %v776_v34 = vpop.f32.mrf.mxu1  ;;  %v915_v2 = vsel %vm1882_vm10, %v878_v51, 0.0  ;;  %v849_v48 = vand.u32 15, %v833_v6  ;;  %v929_v10 = vmax.f32 %v927_v25, %v928_v26  ;;  %v416_v55 = vadd.f32 %v1805_v7, %v1807_v8 }
 0x10e   :  { %v918_v33 = vsel %vm1900_vm11, %v881_v53, 0.0  ;;  %v879_v9 = vmax.f32 %v863_v54, 0.0  ;;  %v620_v14 = vadd.f32 %v1325_v36, %v411_v57  ;;  %v868_v58 = vadd.f32 %v1830_v1, %v814_v56 }
 0x10f   :  { %v948_v42 = vmax.f32 %v917_v13, %v918_v33  ;;  %v812_v59 = vadd.f32 %v773_v45, %v617_v35  ;;  %v581_v0 = vpop.f32.mrf.mxu0  ;;  %v1348_v50 = vpop.f32.mrf.mxu1  ;;  %v427_v32 = vadd.f32 %v1809_v12, %v1811_v15  ;;  %v834_v24 = vadd.s32 120, %v1505_v4 }
 0x110   :  { %v916_v43 = vsel %vm1905_vm12, %v879_v9, 0.0  ;;  %v815_v17 = vadd.f32 %v1345_v30, %v620_v14  ;;  %v618_v44 = vadd.f32 %v581_v0, %v403_v62  ;;  %v884_v38 = vmax.f32 %v868_v58, 0.0 }
 0x111   :  { %v941_v60 = vmax.f32 %v915_v2, %v916_v43  ;;  %v1328_v46 = vpop.f32.mrf.mxu0  ;;  %v866_v18 = vadd.f32 %v1830_v1, %v812_v59  ;;  %v949_v11 = vrot.slane %v948_v42, 4  ;;  %v937_v16 = vrot.slane %v936_v20, 2  ;;  %v789_v30 = vpop.f32.mrf.mxu1 }
 0x112   :  { %v869_v49 = vadd.f32 %v1830_v1, %v815_v17  ;;  %v813_v39 = vadd.f32 %v776_v34, %v618_v44  ;;  %v623_v52 = vadd.f32 %v1328_v46, %v424_v47  ;;  %v930_v51 = vrot.slane %v929_v10, 2 }
 0x113   :  { %v942_v37 = vrot.slane %v941_v60, 4  ;;  %v594_v3 = vpop.f32.mrf.mxu0  ;;  %v882_v5 = vmax.f32 %v866_v18, 0.0  ;;  %v950_v53 = vmax.f32 %v948_v42, %v949_v11  ;;  %v921_v54 = vsel %vm1921_vm14, %v884_v38, 0.0  ;;  %v1349_v13 = vpop.f32.mrf.mxu1 }
 0x114   :  { %v885_v21 = vmax.f32 %v869_v49, 0.0  ;;  %v867_v45 = vadd.f32 %v1830_v1, %v813_v39  ;;  %v818_v28 = vadd.f32 %v1348_v50, %v623_v52  ;;  %v621_v56 = vadd.f32 %v594_v3, %v416_v55 }
 0x115   :  { %v943_v23 = vmax.f32 %v941_v60, %v942_v37  ;;  %v1329_v31 = vpop.f32.mrf.mxu0  ;;  %v919_v7 = vsel %vm1926_vm15, %v882_v5, 0.0  ;;  %vm1966_vm1 = vcmp.lt.s32.totalorder %v849_v48, %v1823_v27  ;;  %v831_v63 = vadd.s32 96, %v1505_v4  ;;  %v792_v61 = vpop.f32.mrf.mxu1 }
 0x116   :  { %v922_v57 = vsel %vm1915_vm13, %v885_v21, 0.0  ;;  %v883_v25 = vmax.f32 %v867_v45, 0.0  ;;  %v872_v41 = vadd.f32 %v1830_v1, %v818_v28  ;;  %v816_v36 = vadd.f32 %v789_v30, %v621_v56 }
 0x117   :  { %v944_v8 = vrot.slane %v943_v23, 2  ;;  %v962_v12 = vmax.f32 %v921_v54, %v922_v57  ;;  %v624_v6 = vadd.f32 %v1329_v31, %v427_v32  ;;  %v597_v33 = vpop.f32.mrf.mxu0  ;;  %v419_v9 = vadd.f32 %v1813_v19, %v1817_v22 }
 0x118   :  { %v920_v15 = vsel %vm1945_vm0, %v883_v25, 0.0  ;;  %v931_v14 = vmax.f32 %v929_v10, %v930_v51  ;;  %v850_v26 = vand.u32 15, %v834_v24  ;;  %v938_v42 = vmax.f32 %v936_v20, %v937_v16 }
 0x119   :  { %v955_v29 = vmax.f32 %v919_v7, %v920_v15  ;;  %v963_v35 = vrot.slane %v962_v12, 4  ;;  %v951_v58 = vrot.slane %v950_v53, 2  ;;  %v945_v59 = vmax.f32 %v943_v23, %v944_v8 }
 0x11a   :  { %v819_v0 = vadd.f32 %v1349_v13, %v624_v6  ;;  %v870_v4 = vadd.f32 %v1830_v1, %v816_v36  ;;  %v622_v17 = vadd.f32 %v597_v33, %v419_v9  ;;  %v888_v44 = vmax.f32 %v872_v41, 0.0 }
 0x11b   :  { %v956_v34 = vrot.slane %v955_v29, 4  ;;  %v964_v2 = vmax.f32 %v962_v12, %v963_v35  ;;  %v847_v47 = vand.u32 15, %v831_v63  ;;  %v848_v46 = vand.u32 15, %v832_v40 }
 0x11c   :  { %v873_v60 = vadd.f32 %v1830_v1, %v819_v0  ;;  %v932_v48 = vrot.slane %v931_v14, 1  ;;  %vm910_vm2 = vcmp.lt.s32.totalorder %v850_v26, %v1823_v27  ;;  %v817_v22 = vadd.f32 %v792_v61, %v622_v17 }
 0x11d   :  { %v957_v43 = vmax.f32 %v955_v29, %v956_v34  ;;  %v939_v20 = vrot.slane %v938_v42, 1  ;;  %v952_v18 = vmax.f32 %v950_v53, %v951_v58  ;;  %v946_v49 = vrot.slane %v945_v59, 1 }
 0x11e   :  { %v889_v39 = vmax.f32 %v873_v60, 0.0  ;;  %v965_v50 = vrot.slane %v964_v2, 2  ;;  %v886_v11 = vmax.f32 %v870_v4, 0.0  ;;  %v871_v37 = vadd.f32 %v1830_v1, %v817_v22 }
 0x11f   :  { %v958_v19 = vrot.slane %v957_v43, 2  ;;  %v925_v38 = vsel %vm1966_vm1, %v888_v44, 0.0  ;;  %vm907_vm3 = vcmp.lt.s32.totalorder %v847_v47, %v1823_v27  ;;  %vm908_vm4 = vcmp.lt.s32.totalorder %v848_v46, %v1823_v27 }
 0x120   :  { %v926_v3 = vsel %vm910_vm2, %v889_v39, 0.0  ;;  %v933_v5 = vmax.f32 %v931_v14, %v932_v48  ;;  %v887_v45 = vmax.f32 %v871_v37, 0.0  ;;  %v940_v52 = vmax.f32 %v938_v42, %v939_v20  ;;  %v1212_v48 = vld [vmem:[%s1994_s5] ss:$0 sm:$0xff] }
 0x121   :  { %v959_v10 = vmax.f32 %v957_v43, %v958_v19  ;;  %v976_v21 = vmax.f32 %v925_v38, %v926_v3  ;;  %v953_v55 = vrot.slane %v952_v18, 1  ;;  %v947_v32 = vmax.f32 %v945_v59, %v946_v49 }
 0x122   :  { %v966_v24 = vmax.f32 %v964_v2, %v965_v50  ;;  %v923_v16 = vsel %vm907_vm3, %v886_v11, 0.0  ;;  %v924_v25 = vsel %vm908_vm4, %v887_v45, 0.0  ;;  %v983_v28 = vpack.c.bf16 %v933_v5, %v933_v5 }
 0x123   :  { %v960_v23 = vrot.slane %v959_v10, 1  ;;  %v977_v57 = vrot.slane %v976_v21, 4  ;;  %v969_v1 = vmax.f32 %v923_v16, %v924_v25  ;;  %v985_v31 = vpack.c.bf16 %v947_v32, %v947_v32 }
 0x124   :  { %v984_v54 = vpack.c.bf16 %v940_v52, %v940_v52  ;;  %v954_v7 = vmax.f32 %v952_v18, %v953_v55  ;;  %v967_v27 = vrot.slane %v966_v24, 1  ;;  %v1022_v15 = vunpack.c.l.b16 %v983_v28 }
 0x125   :  { %v978_v30 = vmax.f32 %v976_v21, %v977_v57  ;;  %v961_v51 = vmax.f32 %v959_v10, %v960_v23  ;;  %v970_v53 = vrot.slane %v969_v1, 4  ;;  %v1024_v29 = vunpack.c.l.b16 %v985_v31 }
 0x126   :  { %v1023_v40 = vunpack.c.l.b16 %v984_v54  ;;  %v986_v35 = vpack.c.bf16 %v954_v7, %v954_v7  ;;  %v968_v41 = vmax.f32 %v966_v24, %v967_v27  ;;  %vm1034_vm7 = vcmask 1043459  }
 0x127   :  { %v979_v8 = vrot.slane %v978_v30, 2  ;;  %v971_v12 = vmax.f32 %v969_v1, %v970_v53  ;;  %v987_v62 = vpack.c.bf16 %v961_v51, %v961_v51  ;;  %vm1036_vm8 = vcmask 1044484  }
 0x128   :  { %v1031_v13 = vsel %vm1030_vm5, %v1023_v40, %v1022_v15  ;;  %v1025_v26 = vunpack.c.l.b16 %v986_v35  ;;  %v988_v42 = vpack.c.bf16 %v968_v41, %v968_v41  ;;  %vm1038_vm9 = vcmask 1045509  }
 0x129   :  { %v980_v56 = vmax.f32 %v978_v30, %v979_v8  ;;  %v972_v63 = vrot.slane %v971_v12, 2  ;;  %v1033_v9 = vsel %vm1032_vm6, %v1024_v29, %v1031_v13  ;;  %v1026_v14 = vunpack.c.l.b16 %v987_v62 }
 0x12a   :  { %v1035_v59 = vsel %vm1034_vm7, %v1025_v26, %v1033_v9  ;;  %v1027_v4 = vunpack.c.l.b16 %v988_v42  ;;  %vm1040_vm10 = vcmask 1046534   ;;  %vm1042_vm11 = vcmask 1047559  }
 0x12b   :  { %v981_v36 = vrot.slane %v980_v56, 1  ;;  %v973_v6 = vmax.f32 %v971_v12, %v972_v63  ;;  %v1037_v2 = vsel %vm1036_vm8, %v1026_v14, %v1035_v59 }
 0x12c   :  { %v1039_v47 = vsel %vm1038_vm9, %v1027_v4, %v1037_v2 }
 0x12d   :  { %v982_v33 = vmax.f32 %v980_v56, %v981_v36  ;;  %v974_v34 = vrot.slane %v973_v6, 1 }
 0x12f   :  { %v975_v58 = vmax.f32 %v973_v6, %v974_v34  ;;  %v990_v0 = vpack.c.bf16 %v982_v33, %v982_v33 }
 0x131   :  { %v989_v43 = vpack.c.bf16 %v975_v58, %v975_v58  ;;  %v1029_v44 = vunpack.c.l.b16 %v990_v0 }
 0x133   :  { %v1028_v17 = vunpack.c.l.b16 %v989_v43 }
 0x135   :  { %v1041_v60 = vsel %vm1040_vm10, %v1028_v17, %v1039_v47 }
 0x136   :  { %v1043_v61 = vsel %vm1042_vm11, %v1029_v44, %v1041_v60 }
 0x137   :  { %v1044_v46 = vpack.c.b16 %v1043_v61, %v1043_v61 }
 0x139   :  { %1367 = vmatmul.mubr.bf16.vlgmr.msra.gmra.mxu0 %v1044_v46 }
 0x1f9   :  { %v1128_v19 = vpop.f32.mrf.mxu0 }
 0x1fa   :  { %v1129_v22 = vadd.f32 %v1212_v48, %v1128_v19 }
 0x1fb   :  { %v1368_v20 = vpop.f32.mrf.mxu0 }
 0x1fc   :  { %1134 = vst [vmem:[#allocation5] sm:$0xff] %v1129_v22 }
 0x1fd   :  { %v1131_v18 = vpop.f32.mrf.mxu0 }
 0x1fe   :  { %1439 = shalt.err (!%p1436_p9)
}
 0x1ff   :  { %1144 = dma.vmem_to_hbm [thread:$0]  %s1142_s13, 128, %s1995_s6, [#allocation4]   ;;  %v1369_v49 = vpop.f32.mrf.mxu0 }
 0x200   :  { %1450 = dma.done.wait [#allocation4], 128  }
 0x201   :  { %1451 = vsyncadd [#allocation4], 4294967168 }
 0x202   :  { %1148 = vsyncpa [#allocation3], 1 }
 0x203   :  { %1149 = vsyncpa [#allocation4], 1 }

</bundles_post_ra>
